<compile_context>
chip_gen: v6e
topology: v6e:2x2x1
jax: 0.10.0
libtpu: 0.0.40
codegen_flags: <defaults>
</compile_context>

<pallas_src>
import math

import jax
import jax.numpy as jnp
import numpy as np
from jax.experimental import pallas as pl
from jax.experimental.pallas import tpu as pltpu

KERNEL = 3
STRIDE = 2
PADDING = 0  # padding == 0, so count_include_pad has no effect on the divisor


def _pool_output_length(L):
    """PyTorch AvgPool1d output length for kernel=3, stride=2, padding=0, ceil_mode=True."""
    lout = math.ceil((L + 2 * PADDING - KERNEL) / STRIDE) + 1
    # PyTorch rule: drop the last window if it starts entirely in the padding.
    if (lout - 1) * STRIDE >= L + PADDING:
        lout -= 1
    return max(lout, 0)


def _fold_groups(R, L):
    """Largest divisor G of R with G*L <= 128 (lane folding for short sequences)."""
    if L > 128:
        return 1
    g_max = min(R, 128 // L)
    best = 1
    for g in range(1, g_max + 1):
        if R % g == 0:
            best = g
    return best


def _pooling_matrix(L, L_out, G, dtype):
    """Static (G*L, G*L_out) block-diagonal 0/1 membership matrix (exact in any float dtype)."""
    p = np.zeros((L, L_out), dtype=np.float32)
    for j in range(L_out):
        start = j * STRIDE
        end = min(start + KERNEL, L)  # padding == 0 -> clip the tail window to the input
        p[start:end, j] = 1.0
    if G > 1:
        p = np.kron(np.eye(G, dtype=np.float32), p)
    return jnp.asarray(p, dtype=dtype)


def _inv_window_lengths(L, L_out, G):
    """(1, G*L_out) f32 row of 1/window_len (clipped tail window gets 1/len, like PyTorch)."""
    inv = np.empty((L_out,), dtype=np.float32)
    for j in range(L_out):
        start = j * STRIDE
        end = min(start + KERNEL, L)
        inv[j] = 1.0 / float(end - start)
    if G > 1:
        inv = np.tile(inv, G)
    return jnp.asarray(inv[None, :], dtype=jnp.float32)


def _avgpool1d_kernel(x_ref, p_ref, s_ref, o_ref):
    # One MXU matmul per row tile (f32 accumulation), then a single broadcast VPU
    # multiply with the per-window reciprocals.
    acc = jnp.dot(x_ref[...], p_ref[...], preferred_element_type=jnp.float32)
    o_ref[...] = (acc * s_ref[...]).astype(o_ref.dtype)


def _vmem_capacity_bytes():
    try:
        return int(pltpu.get_tpu_info().vmem_capacity_bytes)
    except Exception:
        return 64 << 20  # conservative (v7x-sized) default


def _choose_row_tile(R2, Lf, Lf_out, dtype, vmem_budget, resident_bytes):
    isz = jnp.dtype(dtype).itemsize
    sub = max(8, 32 // isz)  # sublane packing: 8 for f32, 16 for bf16
    if R2 <= sub:
        return int(R2)  # single full-extent row block (block dim == full array dim)
    # Bytes per row: double-buffered in/out tiles + the f32 matmul result.
    per_row = 2 * Lf * isz + 2 * Lf_out * isz + Lf_out * 4
    avail = vmem_budget - resident_bytes - (1 << 20)  # headroom
    tr_budget = max(sub, avail // per_row)
    # ~8 MiB input tiles on 128 MiB-VMEM parts (v5e/v6e), ~4 MiB on 64 MiB parts (v7x).
    target_bytes = (8 << 20) if vmem_budget >= (96 << 20) else (4 << 20)
    tr_target = max(sub, target_bytes // max(1, Lf * isz))
    tr = min(tr_budget, tr_target)
    tr = max(sub, (tr // sub) * sub)
    if tr >= R2:
        # Keep >=2 grid steps so megacore parts can split the row axis and the
        # input/output pipeline has something to overlap with.
        tr = (((R2 + 1) // 2) + sub - 1) // sub * sub
    return int(tr)


def _make_pallas_call(TR, R2, Lf, Lf_out, dtype, vmem_limit, cost, single_buffer_consts):
    if single_buffer_consts:
        # Constant index maps -> one buffer is enough; halves their VMEM footprint.
        const_kw = dict(pipeline_mode=pl.Buffered(1))
    else:
        const_kw = {}
    return pl.pallas_call(
        _avgpool1d_kernel,
        out_shape=jax.ShapeDtypeStruct((R2, Lf_out), dtype),
        grid=(pl.cdiv(R2, TR),),
        in_specs=[
            pl.BlockSpec((TR, Lf), lambda i: (i, 0)),                  # row tile of x
            pl.BlockSpec((Lf, Lf_out), lambda i: (0, 0), **const_kw),  # resident 0/1 pooling matrix
            pl.BlockSpec((1, Lf_out), lambda i: (0, 0), **const_kw),   # resident reciprocal row
        ],
        out_specs=pl.BlockSpec((TR, Lf_out), lambda i: (i, 0)),
        compiler_params=pltpu.CompilerParams(
            dimension_semantics=("parallel",),  # shard row tiles across TCs on v7x
            vmem_limit_bytes=int(vmem_limit),
        ),
        cost_estimate=cost,
    )


def avg_pool1d(x):
    """x: (N, C, L) -> (N, C, L_out); PyTorch AvgPool1d(3, 2, 0, ceil_mode=True) semantics."""
    N, C, L = x.shape
    L_out = _pool_output_length(L)
    R = N * C
    if R == 0 or L_out == 0:
        return jnp.zeros((N, C, L_out), x.dtype)

    G = _fold_groups(R, L)
    R2, Lf, Lf_out = R // G, G * L, G * L_out
    x2d = x.reshape(R2, Lf)  # contiguous -> free reshape, no extra HBM traffic

    p = _pooling_matrix(L, L_out, G, x.dtype)  # (Lf, Lf_out), 0/1 in x.dtype
    s = _inv_window_lengths(L, L_out, G)       # (1, Lf_out), f32

    isz = jnp.dtype(x.dtype).itemsize
    vmem_cap = _vmem_capacity_bytes()
    vmem_limit = (vmem_cap * 3) // 4           # ~96-100 MiB on v5e/v6e, ~48 MiB on v7x
    resident = 2 * Lf * Lf_out * isz + 2 * Lf_out * 4
    TR = _choose_row_tile(R2, Lf, Lf_out, x.dtype, vmem_limit, resident)

    cost = pl.CostEstimate(
        flops=2 * R2 * Lf * Lf_out + R2 * Lf_out,
        transcendentals=0,
        bytes_accessed=R2 * Lf * isz + R2 * Lf_out * isz + Lf * Lf_out * isz + Lf_out * 4,
    )

    try:
        out2d = _make_pallas_call(TR, R2, Lf, Lf_out, x.dtype, vmem_limit, cost, True)(x2d, p, s)
        out2d = jax.block_until_ready(out2d)
    except Exception:
        # Fallback for jax versions without BlockSpec(pipeline_mode=...): default buffering.
        out2d = _make_pallas_call(TR, R2, Lf, Lf_out, x.dtype, vmem_limit, cost, False)(x2d, p, s)

    return out2d.reshape(N, C, L_out)


def _reference_avgpool1d(x):
    """Pure-JAX reference matching PyTorch AvgPool1d(3, 2, 0, ceil_mode=True) semantics."""
    N, C, L = x.shape
    L_out = _pool_output_length(L)
    xf = x.astype(jnp.float32)
    cols = []
    for j in range(L_out):
        start = j * STRIDE
        end = min(start + KERNEL, L)
        cols.append(jnp.mean(xf[:, :, start:end], axis=-1))
    return jnp.stack(cols, axis=-1)


if __name__ == "__main__":
    key = jax.random.PRNGKey(0)
    # Small deterministic cases exercising: folded lane-dense path + clipped tail window,
    # odd lengths, the unfolded multi-tile grid with a partial last row tile, and bf16.
    cases = [
        ((2, 4, 16), jnp.float32),
        ((2, 3, 37), jnp.float32),
        ((4, 9, 200), jnp.float32),
        ((2, 4, 16), jnp.bfloat16),
    ]
    for idx, (shape, dtype) in enumerate(cases):
        k = jax.random.fold_in(key, idx)
        x = jax.random.normal(k, shape, dtype=jnp.float32).astype(dtype)

        out = jax.block_until_ready(avg_pool1d(x))
        ref = _reference_avgpool1d(x)

        assert out.shape == ref.shape, (shape, out.shape, ref.shape)
        tol = 1e-5 if dtype == jnp.float32 else 2e-2
        assert jnp.allclose(out.astype(jnp.float32), ref, atol=tol, rtol=tol), (
            "mismatch vs reference", shape, dtype)

    print("KERNEL_OK")
</pallas_src>

<mosaic_0001>
module attributes {stable_mosaic.version = 11 : i64} {
  func.func @_avgpool1d_kernel(%arg0: i32, %arg1: memref<1x128xf32, #tpu.memory_space<vmem>>, %arg2: memref<128x64xf32, #tpu.memory_space<vmem>>, %arg3: memref<1x64xf32, #tpu.memory_space<vmem>>, %arg4: memref<1x64xf32, #tpu.memory_space<vmem>>) attributes {dimension_semantics = [#tpu.dimension_semantics<parallel>], iteration_bounds = array<i64: 1>, scalar_prefetch = 0 : i64, scratch_operands = 0 : i64, tpu.core_type = #tpu.core_type<tc>, window_params = [{transform_indices = @transform_0, window_bounds = array<i64: 1, 128>}, {pipeline_mode = #tpu.pipeline_mode<synchronous>, transform_indices = @transform_1, window_bounds = array<i64: 128, 64>}, {pipeline_mode = #tpu.pipeline_mode<synchronous>, transform_indices = @transform_2, window_bounds = array<i64: 1, 64>}, {transform_indices = @transform_3, window_bounds = array<i64: 1, 64>}]} {
    %c0 = arith.constant 0 : index
    %c0_0 = arith.constant 0 : index
    %0 = vector.load %arg1[%c0, %c0_0] : memref<1x128xf32, #tpu.memory_space<vmem>>, vector<1x128xf32>
    %c0_1 = arith.constant 0 : index
    %c0_2 = arith.constant 0 : index
    %1 = vector.load %arg2[%c0_1, %c0_2] : memref<128x64xf32, #tpu.memory_space<vmem>>, vector<128x64xf32>
    %cst = arith.constant dense<0.000000e+00> : vector<1x64xf32>
    %2 = tpu.matmul %0, %1, %cst {dimension_numbers = #tpu.dot_dimension_numbers<[1], [0], [0], [1], [0, 0, 1, 1], [], []>} : vector<1x128xf32>, vector<128x64xf32>, vector<1x64xf32> -> vector<1x64xf32>
    %c0_3 = arith.constant 0 : index
    %c0_4 = arith.constant 0 : index
    %3 = vector.load %arg3[%c0_3, %c0_4] : memref<1x64xf32, #tpu.memory_space<vmem>>, vector<1x64xf32>
    %4 = arith.mulf %2, %3 : vector<1x64xf32>
    %c0_5 = arith.constant 0 : index
    %c0_6 = arith.constant 0 : index
    %5 = vector.load %arg4[%c0_5, %c0_6] : memref<1x64xf32, #tpu.memory_space<vmem>>, vector<1x64xf32>
    tpu.vector_store %arg4[%c0_5, %c0_6], %4 {strides = array<i32>} : memref<1x64xf32, #tpu.memory_space<vmem>>, vector<1x64xf32>,
    return
  }
  func.func @transform_0(%arg0: i32) -> (i32, i32) {
    %c0_i32 = arith.constant 0 : i32
    %c0_i32_0 = arith.constant 0 : i32
    return %arg0, %c0_i32 : i32, i32
  }
  func.func @transform_1(%arg0: i32) -> (i32, i32) {
    %c0_i32 = arith.constant 0 : i32
    %c0_i32_0 = arith.constant 0 : i32
    %c0_i32_1 = arith.constant 0 : i32
    return %c0_i32, %c0_i32_0 : i32, i32
  }
  func.func @transform_2(%arg0: i32) -> (i32, i32) {
    %c0_i32 = arith.constant 0 : i32
    %c0_i32_0 = arith.constant 0 : i32
    %c0_i32_1 = arith.constant 0 : i32
    return %c0_i32, %c0_i32_0 : i32, i32
  }
  func.func @transform_3(%arg0: i32) -> (i32, i32) {
    %c0_i32 = arith.constant 0 : i32
    %c0_i32_0 = arith.constant 0 : i32
    return %arg0, %c0_i32 : i32, i32
  }
}

module attributes {stable_mosaic.version = 11 : i64} {
  func.func @_avgpool1d_kernel(%arg0: i32, %arg1: memref<1x128xf32, #tpu.memory_space<vmem>>, %arg2: memref<128x64xf32, #tpu.memory_space<vmem>>, %arg3: memref<1x64xf32, #tpu.memory_space<vmem>>, %arg4: memref<1x64xf32, #tpu.memory_space<vmem>>) attributes {dimension_semantics = [#tpu.dimension_semantics<parallel>], iteration_bounds = array<i64: 1>, scalar_prefetch = 0 : i64, scratch_operands = 0 : i64, tpu.core_type = #tpu.core_type<tc>, window_params = [{transform_indices = @transform_0, window_bounds = array<i64: 1, 128>}, {pipeline_mode = #tpu.pipeline_mode<synchronous>, transform_indices = @transform_1, window_bounds = array<i64: 128, 64>}, {pipeline_mode = #tpu.pipeline_mode<synchronous>, transform_indices = @transform_2, window_bounds = array<i64: 1, 64>}, {transform_indices = @transform_3, window_bounds = array<i64: 1, 64>}]} {
    %c0 = arith.constant 0 : index
    %c0_0 = arith.constant 0 : index
    %0 = vector.load %arg1[%c0, %c0_0] : memref<1x128xf32, #tpu.memory_space<vmem>>, vector<1x128xf32>
    %c0_1 = arith.constant 0 : index
    %c0_2 = arith.constant 0 : index
    %1 = vector.load %arg2[%c0_1, %c0_2] : memref<128x64xf32, #tpu.memory_space<vmem>>, vector<128x64xf32>
    %cst = arith.constant dense<0.000000e+00> : vector<1x64xf32>
    %2 = tpu.matmul %0, %1, %cst {dimension_numbers = #tpu.dot_dimension_numbers<[1], [0], [0], [1], [0, 0, 1, 1], [], []>} : vector<1x128xf32>, vector<128x64xf32>, vector<1x64xf32> -> vector<1x64xf32>
    %c0_3 = arith.constant 0 : index
    %c0_4 = arith.constant 0 : index
    %3 = vector.load %arg3[%c0_3, %c0_4] : memref<1x64xf32, #tpu.memory_space<vmem>>, vector<1x64xf32>
    %4 = arith.mulf %2, %3 : vector<1x64xf32>
    %c0_5 = arith.constant 0 : index
    %c0_6 = arith.constant 0 : index
    %5 = vector.load %arg4[%c0_5, %c0_6] : memref<1x64xf32, #tpu.memory_space<vmem>>, vector<1x64xf32>
    tpu.vector_store %arg4[%c0_5, %c0_6], %4 {strides = array<i32>} : memref<1x64xf32, #tpu.memory_space<vmem>>, vector<1x64xf32>,
    return
  }
  func.func @transform_0(%arg0: i32) -> (i32, i32) {
    %c0_i32 = arith.constant 0 : i32
    %c0_i32_0 = arith.constant 0 : i32
    return %arg0, %c0_i32 : i32, i32
  }
  func.func @transform_1(%arg0: i32) -> (i32, i32) {
    %c0_i32 = arith.constant 0 : i32
    %c0_i32_0 = arith.constant 0 : i32
    %c0_i32_1 = arith.constant 0 : i32
    return %c0_i32, %c0_i32_0 : i32, i32
  }
  func.func @transform_2(%arg0: i32) -> (i32, i32) {
    %c0_i32 = arith.constant 0 : i32
    %c0_i32_0 = arith.constant 0 : i32
    %c0_i32_1 = arith.constant 0 : i32
    return %c0_i32, %c0_i32_0 : i32, i32
  }
  func.func @transform_3(%arg0: i32) -> (i32, i32) {
    %c0_i32 = arith.constant 0 : i32
    %c0_i32_0 = arith.constant 0 : i32
    return %arg0, %c0_i32 : i32, i32
  }
}

</mosaic_0001>

<bundles_post_ra>
// kernel: tpu_custom_call.1
= control target key start
LH: loop header
LB: loop body
LE: loop exit
PB: predicated region body
PF: predicated region fallthrough
CT: control target
= control target key end

     0   :  { %v197_v1 = vmov 0.0   ;;  %vm198_vm0 = vmmov 0   ;;  %s277_s0 = inlined_call_operand.vmem [shape: f32[1,128], index: 0, kind: input, shape index: {}]   ;;  %s278_s1 = inlined_call_operand.vmem [shape: f32[128,64], index: 1, kind: input, shape index: {}]   ;;  %s279_s2 = inlined_call_operand.vmem [shape: f32[1,64], index: 2, kind: input, shape index: {}]   ;;  %s280_s3 = inlined_call_operand.hbm [shape: f32[1,64], index: 3, kind: output, shape index: {}]  }
   0x1   :  { %v31_v0 = vld [vmem:[%s278_s1 + $0x78] sm:$0xff]  ;;  %137 = vmatprep.subr.mxu0 %v197_v1  ;;  %v30_v2 = vld [vmem:[%s278_s1 + $0x70] sm:$0xff]  ;;  %169 = vmatprep.mubr.msk.f32.mxu0 %vm198_vm0, %v197_v1  ;;  %v29_v3 = vld [vmem:[%s278_s1 + $0x68] sm:$0xff] }
   0x2   :  { %138 = vmatpush3.msra.mxu0 %v31_v0  ;;  %v28_v4 = vld [vmem:[%s278_s1 + $0x60] sm:$0xff] }
   0x3   :  { %139 = vmatprep.subr.mxu0 %v197_v1 }
   0x4   :  { %140 = vmatpush3.msra.mxu0 %v30_v2 }
   0x5   :  { %141 = vmatprep.subr.mxu0 %v197_v1 }
   0x6   :  { %8 = vsyncpa [#allocation3], 0  ;;  %142 = vmatpush3.msra.mxu0 %v29_v3  ;;  %v27_v5 = vld [vmem:[%s278_s1 + $0x58] sm:$0xff]  ;;  %v26_v6 = vld [vmem:[%s278_s1 + $0x50] sm:$0xff]  ;;  %s199_s21 = smov [#allocation2]   ;;  %vm104_vm1 = vcmask 516096  }
   0x7   :  { %143 = vmatprep.subr.mxu0 %v197_v1  ;;  %v25_v7 = vld [vmem:[%s278_s1 + $0x48] sm:$0xff]  ;;  %v24_v8 = vld [vmem:[%s278_s1 + $0x40] sm:$0xff]  ;;  %v23_v9 = vld [vmem:[%s278_s1 + $0x38] sm:$0xff]  ;;  %s112_s22 = sshll.u32 %s199_s21, 4  ;;  %s113_s22 = int_to_ptr.vmem [resolvable:$true] %s112_s22 }
   0x8   :  { %144 = vmatpush3.msra.mxu0 %v28_v4  ;;  %v22_v10 = vld [vmem:[%s278_s1 + $0x30] sm:$0xff]  ;;  %v21_v11 = vld [vmem:[%s278_s1 + $0x28] sm:$0xff]  ;;  %v20_v12 = vld [vmem:[%s278_s1 + $0x20] sm:$0xff]  ;;  %s179_s23 = scalar_lea.vmem %s113_s22, 32  ;;  %p180_p1 = scmp.lt.s32.totalorder %s113_s22, %s113_s22 }
   0x9   :  { %145 = vmatprep.subr.mxu0 %v197_v1  ;;  %v19_v13 = vld [vmem:[%s278_s1 + $0x18] sm:$0xff]  ;;  %v18_v14 = vld [vmem:[%s278_s1 + $0x10] sm:$0xff]  ;;  %v17_v15 = vld [vmem:[%s278_s1 + $0x8] sm:$0xff] }
   0xa   :  { %146 = vmatpush3.msra.mxu0 %v27_v5  ;;  %v16_v16 = vld [vmem:[%s278_s1] sm:$0xff]  ;;  %s175_s1 = scalar_lea.vmem %s113_s22, 16 }
   0xb   :  { %147 = vmatprep.subr.mxu0 %v197_v1  ;;  %v15_v17 = vld [vmem:[%s277_s0] sm:$0x1]  ;;  %p176_p0 = scmp.ne.s32.totalorder %s113_s22, %s175_s1  ;;  %p181_p2 = scmp.lt.s32.totalorder %s179_s23, %s175_s1 }
   0xc   :  { %148 = vmatpush3.msra.mxu0 %v26_v6  ;;  %v102_v18 = vld [vmem:[%s279_s2] sm:$0x1] }
   0xd   :  { %149 = vmatprep.subr.mxu0 %v197_v1  ;;  %p182_p3 = por %p181_p2, %p180_p1 }
   0xe   :  { %150 = vmatpush3.msra.mxu0 %v25_v7 }
   0xf   :  { %151 = vmatprep.subr.mxu0 %v197_v1  ;;  %p183_p4 = pnand %p182_p3, %p176_p0 }
  0x10   :  { %152 = vmatpush3.msra.mxu0 %v24_v8 }
  0x11   :  { %153 = vmatprep.subr.mxu0 %v197_v1 }
  0x12   :  { %154 = vmatpush3.msra.mxu0 %v23_v9 }
  0x13   :  { %155 = vmatprep.subr.mxu0 %v197_v1 }
  0x14   :  { %156 = vmatpush3.msra.mxu0 %v22_v10 }
  0x15   :  { %157 = vmatprep.subr.mxu0 %v197_v1 }
  0x16   :  { %158 = vmatpush3.msra.mxu0 %v21_v11 }
  0x17   :  { %159 = vmatprep.subr.mxu0 %v197_v1 }
  0x18   :  { %160 = vmatpush3.msra.mxu0 %v20_v12 }
  0x19   :  { %161 = vmatprep.subr.mxu0 %v197_v1 }
  0x1a   :  { %162 = vmatpush3.msra.mxu0 %v19_v13 }
  0x1b   :  { %163 = vmatprep.subr.mxu0 %v197_v1 }
  0x1c   :  { %164 = vmatpush3.msra.mxu0 %v18_v14 }
  0x1d   :  { %165 = vmatprep.subr.mxu0 %v197_v1 }
  0x1e   :  { %166 = vmatpush3.msra.mxu0 %v17_v15 }
  0x1f   :  { %167 = vmatprep.subr.mxu0 %v197_v1 }
  0x20   :  { %168 = vmatpush3.msra.mxu0 %v16_v16 }
  0x21   :  { %170 = vmatmul.mubr.f32.vlgmr.msra.gmra.mxu0 %v15_v17 }
  0xe1   :  { %v98_v19 = vpop.f32.mrf.mxu0 }
  0xe2   :  { %v103_v20 = vmul.f32 %v102_v18, %v98_v19 }
  0xe3   :  { %v171_v21 = vpop.f32.mrf.mxu0 }
  0xe4   :  { %105 = vst.msk [vmem:[#allocation2] sm:$0x1] %vm104_vm1, %v103_v20 }
  0xe5   :  { %186 = shalt.err (!%p183_p4)
}
  0xe6   :  { %115 = dma.vmem_to_hbm [thread:$0]  %s113_s22, 16, %s280_s3, [#allocation3]  }
  0xe7   :  { %195 = dma.done.wait [#allocation3], 16  }
  0xe8   :  { %196 = vsyncadd [#allocation3], 4294967280 }
  0xe9   :  { %119 = vsyncpa [#allocation3], 1 }

// kernel: tpu_custom_call.1
= control target key start
LH: loop header
LB: loop body
LE: loop exit
PB: predicated region body
PF: predicated region fallthrough
CT: control target
= control target key end

     0   :  { %v197_v1 = vmov 0.0   ;;  %vm198_vm0 = vmmov 0   ;;  %s277_s0 = inlined_call_operand.vmem [shape: f32[1,128], index: 0, kind: input, shape index: {}]   ;;  %s278_s1 = inlined_call_operand.vmem [shape: f32[128,64], index: 1, kind: input, shape index: {}]   ;;  %s279_s2 = inlined_call_operand.vmem [shape: f32[1,64], index: 2, kind: input, shape index: {}]   ;;  %s280_s3 = inlined_call_operand.hbm [shape: f32[1,64], index: 3, kind: output, shape index: {}]  }
   0x1   :  { %v31_v0 = vld [vmem:[%s278_s1 + $0x78] sm:$0xff]  ;;  %137 = vmatprep.subr.mxu0 %v197_v1  ;;  %v30_v2 = vld [vmem:[%s278_s1 + $0x70] sm:$0xff]  ;;  %169 = vmatprep.mubr.msk.f32.mxu0 %vm198_vm0, %v197_v1  ;;  %v29_v3 = vld [vmem:[%s278_s1 + $0x68] sm:$0xff] }
   0x2   :  { %138 = vmatpush3.msra.mxu0 %v31_v0  ;;  %v28_v4 = vld [vmem:[%s278_s1 + $0x60] sm:$0xff] }
   0x3   :  { %139 = vmatprep.subr.mxu0 %v197_v1 }
   0x4   :  { %140 = vmatpush3.msra.mxu0 %v30_v2 }
   0x5   :  { %141 = vmatprep.subr.mxu0 %v197_v1 }
   0x6   :  { %8 = vsyncpa [#allocation3], 0  ;;  %142 = vmatpush3.msra.mxu0 %v29_v3  ;;  %v27_v5 = vld [vmem:[%s278_s1 + $0x58] sm:$0xff]  ;;  %v26_v6 = vld [vmem:[%s278_s1 + $0x50] sm:$0xff]  ;;  %s199_s21 = smov [#allocation2]   ;;  %vm104_vm1 = vcmask 516096  }
   0x7   :  { %143 = vmatprep.subr.mxu0 %v197_v1  ;;  %v25_v7 = vld [vmem:[%s278_s1 + $0x48] sm:$0xff]  ;;  %v24_v8 = vld [vmem:[%s278_s1 + $0x40] sm:$0xff]  ;;  %v23_v9 = vld [vmem:[%s278_s1 + $0x38] sm:$0xff]  ;;  %s112_s22 = sshll.u32 %s199_s21, 4  ;;  %s113_s22 = int_to_ptr.vmem [resolvable:$true] %s112_s22 }
   0x8   :  { %144 = vmatpush3.msra.mxu0 %v28_v4  ;;  %v22_v10 = vld [vmem:[%s278_s1 + $0x30] sm:$0xff]  ;;  %v21_v11 = vld [vmem:[%s278_s1 + $0x28] sm:$0xff]  ;;  %v20_v12 = vld [vmem:[%s278_s1 + $0x20] sm:$0xff]  ;;  %s179_s23 = scalar_lea.vmem %s113_s22, 32  ;;  %p180_p1 = scmp.lt.s32.totalorder %s113_s22, %s113_s22 }
   0x9   :  { %145 = vmatprep.subr.mxu0 %v197_v1  ;;  %v19_v13 = vld [vmem:[%s278_s1 + $0x18] sm:$0xff]  ;;  %v18_v14 = vld [vmem:[%s278_s1 + $0x10] sm:$0xff]  ;;  %v17_v15 = vld [vmem:[%s278_s1 + $0x8] sm:$0xff] }
   0xa   :  { %146 = vmatpush3.msra.mxu0 %v27_v5  ;;  %v16_v16 = vld [vmem:[%s278_s1] sm:$0xff]  ;;  %s175_s1 = scalar_lea.vmem %s113_s22, 16 }
   0xb   :  { %147 = vmatprep.subr.mxu0 %v197_v1  ;;  %v15_v17 = vld [vmem:[%s277_s0] sm:$0x1]  ;;  %p176_p0 = scmp.ne.s32.totalorder %s113_s22, %s175_s1  ;;  %p181_p2 = scmp.lt.s32.totalorder %s179_s23, %s175_s1 }
   0xc   :  { %148 = vmatpush3.msra.mxu0 %v26_v6  ;;  %v102_v18 = vld [vmem:[%s279_s2] sm:$0x1] }
   0xd   :  { %149 = vmatprep.subr.mxu0 %v197_v1  ;;  %p182_p3 = por %p181_p2, %p180_p1 }
   0xe   :  { %150 = vmatpush3.msra.mxu0 %v25_v7 }
   0xf   :  { %151 = vmatprep.subr.mxu0 %v197_v1  ;;  %p183_p4 = pnand %p182_p3, %p176_p0 }
  0x10   :  { %152 = vmatpush3.msra.mxu0 %v24_v8 }
  0x11   :  { %153 = vmatprep.subr.mxu0 %v197_v1 }
  0x12   :  { %154 = vmatpush3.msra.mxu0 %v23_v9 }
  0x13   :  { %155 = vmatprep.subr.mxu0 %v197_v1 }
  0x14   :  { %156 = vmatpush3.msra.mxu0 %v22_v10 }
  0x15   :  { %157 = vmatprep.subr.mxu0 %v197_v1 }
  0x16   :  { %158 = vmatpush3.msra.mxu0 %v21_v11 }
  0x17   :  { %159 = vmatprep.subr.mxu0 %v197_v1 }
  0x18   :  { %160 = vmatpush3.msra.mxu0 %v20_v12 }
  0x19   :  { %161 = vmatprep.subr.mxu0 %v197_v1 }
  0x1a   :  { %162 = vmatpush3.msra.mxu0 %v19_v13 }
  0x1b   :  { %163 = vmatprep.subr.mxu0 %v197_v1 }
  0x1c   :  { %164 = vmatpush3.msra.mxu0 %v18_v14 }
  0x1d   :  { %165 = vmatprep.subr.mxu0 %v197_v1 }
  0x1e   :  { %166 = vmatpush3.msra.mxu0 %v17_v15 }
  0x1f   :  { %167 = vmatprep.subr.mxu0 %v197_v1 }
  0x20   :  { %168 = vmatpush3.msra.mxu0 %v16_v16 }
  0x21   :  { %170 = vmatmul.mubr.f32.vlgmr.msra.gmra.mxu0 %v15_v17 }
  0xe1   :  { %v98_v19 = vpop.f32.mrf.mxu0 }
  0xe2   :  { %v103_v20 = vmul.f32 %v102_v18, %v98_v19 }
  0xe3   :  { %v171_v21 = vpop.f32.mrf.mxu0 }
  0xe4   :  { %105 = vst.msk [vmem:[#allocation2] sm:$0x1] %vm104_vm1, %v103_v20 }
  0xe5   :  { %186 = shalt.err (!%p183_p4)
}
  0xe6   :  { %115 = dma.vmem_to_hbm [thread:$0]  %s113_s22, 16, %s280_s3, [#allocation3]  }
  0xe7   :  { %195 = dma.done.wait [#allocation3], 16  }
  0xe8   :  { %196 = vsyncadd [#allocation3], 4294967280 }
  0xe9   :  { %119 = vsyncpa [#allocation3], 1 }

</bundles_post_ra>
